<compile_context>
chip_gen: v6e
topology: v6e:2x2x1
jax: 0.10.0
libtpu: 0.0.40
codegen_flags: <defaults>
</compile_context>

<pallas_src>
from functools import partial

import jax
import jax.numpy as jnp
from jax.experimental import pallas as pl
from jax.experimental.pallas import tpu as pltpu

EPS = 1e-12
WEIGHT_TIME = 10.0
WEIGHT_FREQUENCY = 1.0


def _round_up(x, m):
    return (x + m - 1) // m * m


def _stats_kernel(mix_ref, inp_ref, tgt_ref, out_ref,
                  tgt_pow, noise_pow, inp_pow, estn_pow,
                  it_dot, en_dot, sq_err,
                  *, n_full, tile_t, t_valid, need_mask):
    p = pl.program_id(1)           # parallel T-chunk index
    t = pl.program_id(2)           # sequential step within the chunk
    n_steps = pl.num_programs(2)
    accs = (tgt_pow, noise_pow, inp_pow, estn_pow, it_dot, en_dot, sq_err)

    @pl.when(t == 0)
    def _init():
        for acc in accs:
            acc[...] = jnp.zeros_like(acc)

    mix = mix_ref[...].astype(jnp.float32)
    inp = inp_ref[...].astype(jnp.float32)
    tgt = tgt_ref[...].astype(jnp.float32)

    def accumulate(mix, inp, tgt):
        noise = mix - tgt          # true residual (mixture - target)
        est_noise = mix - inp      # estimated residual (mixture - estimate)
        diff = inp - tgt
        # Partial reductions over this T-tile, accumulated per row (= per (B,C)).
        # Direct subtract-and-square form (no algebraic identities) to avoid
        # catastrophic cancellation when mixture ~= target.
        tgt_pow[...] += jnp.sum(tgt * tgt, axis=-1, keepdims=True)
        noise_pow[...] += jnp.sum(noise * noise, axis=-1, keepdims=True)
        inp_pow[...] += jnp.sum(inp * inp, axis=-1, keepdims=True)
        estn_pow[...] += jnp.sum(est_noise * est_noise, axis=-1, keepdims=True)
        it_dot[...] += jnp.sum(inp * tgt, axis=-1, keepdims=True)
        en_dot[...] += jnp.sum(est_noise * noise, axis=-1, keepdims=True)
        sq_err[...] += jnp.sum(diff * diff, axis=-1, keepdims=True)

    # Virtual global T-block index (may exceed the last real block; the
    # index_map clamps the DMA and the mask below zeroes the duplicate data).
    g = p * n_steps + t

    def accumulate_masked():
        col = jax.lax.broadcasted_iota(jnp.int32, mix.shape, 1)
        valid = (g * tile_t + col) < t_valid
        accumulate(jnp.where(valid, mix, 0.0),
                   jnp.where(valid, inp, 0.0),
                   jnp.where(valid, tgt, 0.0))

    if not need_mask:
        # T divides evenly and no virtual overhang: never emit masking code.
        accumulate(mix, inp, tgt)
    elif n_full == 0:
        # Every block is partial (T < tile_t): masked path only.
        accumulate_masked()
    else:
        # Full tiles take the mask-free path; only the tail pays for the mask.
        pl.when(g < n_full)(lambda: accumulate(mix, inp, tgt))
        pl.when(g >= n_full)(accumulate_masked)

    @pl.when(t == n_steps - 1)
    def _finalize():
        # Emit raw per-row partial sums; wSDR / weighting done in the wrapper
        # (lets parallel T-chunks be combined there).
        zero = jnp.zeros_like(tgt_pow[...])
        out_ref[0] = jnp.concatenate(
            [tgt_pow[...], noise_pow[...], inp_pow[...], estn_pow[...],
             it_dot[...], en_dot[...], sq_err[...], zero], axis=-1)


def _choose_tiles(R, T, itemsize, *, max_tile_t=16384,
                  vmem_budget_bytes=12 * 1024 * 1024):
    # Row-block size: split into >=2 blocks whenever sublane alignment allows,
    # so the two v7x TensorCores can shard the row axis.
    if R > 64:
        tile_r = 32
    elif R >= 16 and R % 16 == 0:
        tile_r = R // 2            # multiple of 8, two row blocks
    else:
        tile_r = R                 # full extent (always a legal block dim)
    n_rblk = pl.cdiv(R, tile_r)

    # T-tile: as large as possible under a double-buffered-input VMEM budget
    # in the *input* dtype (bf16 halves the bytes -> doubles tile_t).  The
    # explicit vmem_limit_bytes below keeps this safe on v5e/v6e/v7x.
    per_col_bytes = 3 * 2 * itemsize * tile_r
    budget_cols = max(128, (vmem_budget_bytes // per_col_bytes) // 128 * 128)
    tile_t = int(min(max_tile_t, budget_cols, _round_up(T, 128)))

    # When the row axis collapses to a single block (small / ragged R), split
    # the T range 2-ways on a parallel axis so both v7x cores stay busy.
    n_t_total = pl.cdiv(T, tile_t)
    n_par = 2 if (n_rblk == 1 and n_t_total >= 2) else 1
    return tile_r, tile_t, n_par


def multi_domain_loss(mixture, input, target, *,
                      weight_time=WEIGHT_TIME,
                      weight_frequency=WEIGHT_FREQUENCY,
                      batch_mean=True,
                      max_tile_t=16384):
    # TODO(synk): batch_mean=False path (per-batch loss vector) not implemented.
    assert batch_mean, "only batch_mean=True is implemented"
    assert mixture.shape == input.shape == target.shape
    B, C, T = mixture.shape
    R = B * C

    # Flatten (B, C, T) -> (B*C, T): free reshape (contiguous), fills all 8
    # sublanes instead of padding C -> 8.
    mix2 = mixture.reshape(R, T)
    inp2 = input.reshape(R, T)
    tgt2 = target.reshape(R, T)

    itemsize = jnp.dtype(mixture.dtype).itemsize
    tile_r, tile_t, n_par = _choose_tiles(R, T, itemsize, max_tile_t=max_tile_t)
    n_rblk = pl.cdiv(R, tile_r)
    n_t_total = pl.cdiv(T, tile_t)
    n_steps = pl.cdiv(n_t_total, n_par)
    n_full = T // tile_t                         # number of完全 full T-blocks
    need_clamp = n_par * n_steps > n_t_total     # virtual overhang blocks exist
    need_mask = n_par * n_steps > n_full         # any partial/virtual block

    def in_map(r, p, t):
        g = p * n_steps + t
        if need_clamp:
            g = jnp.minimum(g, n_t_total - 1)    # clamp DMA; kernel masks it
        return (r, g)

    in_blk = pl.BlockSpec((tile_r, tile_t), in_map)
    out_blk = pl.BlockSpec((1, tile_r, 8), lambda r, p, t: (p, r, 0))

    kernel = partial(_stats_kernel, n_full=n_full, tile_t=tile_t,
                     t_valid=T, need_mask=need_mask)

    cost = pl.CostEstimate(
        flops=int(17 * 3 * R * T),
        transcendentals=0,
        bytes_accessed=int(3 * R * T * itemsize + n_par * R * 8 * 4))

    stats = pl.pallas_call(
        kernel,
        out_shape=jax.ShapeDtypeStruct((n_par, R, 8), jnp.float32),
        grid_spec=pltpu.PrefetchScalarGridSpec(
            num_scalar_prefetch=0,
            grid=(n_rblk, n_par, n_steps),
            in_specs=[in_blk, in_blk, in_blk],
            out_specs=out_blk,
            scratch_shapes=[pltpu.VMEM((tile_r, 1), jnp.float32)] * 7,
        ),
        compiler_params=pltpu.CompilerParams(
            dimension_semantics=("parallel", "parallel", "arbitrary"),
            vmem_limit_bytes=32 * 1024 * 1024),
        cost_estimate=cost,
    )(mix2, inp2, tgt2)

    # Tiny finalize on (R, 8) stats: combine parallel chunks, compute wSDR,
    # weight and batch-mean.  loss_time + loss_freq = sum over rows / B.
    s = jnp.sum(stats, axis=0)                   # (R, 8) f32
    tgt_pow, noise_pow = s[:, 0], s[:, 1]
    inp_pow, estn_pow = s[:, 2], s[:, 3]
    it_dot, en_dot, sq_err = s[:, 4], s[:, 5], s[:, 6]

    rho = tgt_pow / (tgt_pow + noise_pow + EPS)
    sdr_tgt = it_dot / (jnp.sqrt(inp_pow) * jnp.sqrt(tgt_pow) + EPS)
    sdr_noise = en_dot / (jnp.sqrt(estn_pow) * jnp.sqrt(noise_pow) + EPS)
    wsdr = rho * sdr_tgt + (1.0 - rho) * sdr_noise
    per_row = weight_time * (-wsdr) + weight_frequency * sq_err
    return jnp.sum(per_row) / B


def multi_domain_loss_ref(mixture, input, target, *,
                          weight_time=WEIGHT_TIME,
                          weight_frequency=WEIGHT_FREQUENCY,
                          eps=EPS):
    noise = mixture - target
    est_noise = mixture - input
    tgt_pow = jnp.sum(target ** 2, axis=-1)
    noise_pow = jnp.sum(noise ** 2, axis=-1)
    rho = tgt_pow / (tgt_pow + noise_pow + eps)
    sdr_tgt = jnp.sum(input * target, -1) / (
        jnp.linalg.norm(input, axis=-1) * jnp.linalg.norm(target, axis=-1) + eps)
    sdr_noise = jnp.sum(est_noise * noise, -1) / (
        jnp.linalg.norm(est_noise, axis=-1) * jnp.linalg.norm(noise, axis=-1) + eps)
    wsdr = rho * sdr_tgt + (1.0 - rho) * sdr_noise
    loss_time = jnp.mean(jnp.sum(-wsdr, axis=1))
    loss_frequency = jnp.mean(jnp.sum((input - target) ** 2, axis=(1, 2)))
    return weight_time * loss_time + weight_frequency * loss_frequency


if __name__ == "__main__":
    key = jax.random.PRNGKey(0)

    def make_case(k, B, C, T, dtype=jnp.float32):
        k1, k2, k3 = jax.random.split(k, 3)
        target = jax.random.normal(k1, (B, C, T), dtype=jnp.float32)
        noise = 0.3 * jax.random.normal(k2, (B, C, T), dtype=jnp.float32)
        mixture = target + noise
        estimate = target + 0.1 * jax.random.normal(k3, (B, C, T), dtype=jnp.float32)
        return (mixture.astype(dtype), estimate.astype(dtype), target.astype(dtype))

    cases = [
        # (B, C, T, kwargs, dtype, rtol)
        (2, 4, 256, {}, jnp.float32, 1e-5),                     # single full tile, no mask path emitted
        (3, 5, 200, {}, jnp.float32, 1e-5),                     # ragged rows (R=15), single masked tile
        (2, 4, 1000, dict(max_tile_t=256), jnp.float32, 1e-5),  # n_par=2, masked tail block
        (2, 4, 768, dict(max_tile_t=256), jnp.float32, 1e-5),   # n_par=2 with clamped virtual block
        (2, 4, 2048, {}, jnp.bfloat16, 1e-3),                   # bf16 inputs (dtype-aware tiling)
    ]
    keys = jax.random.split(key, len(cases))
    for k, (B, C, T, kw, dt, tol) in zip(keys, cases):
        mixture, estimate, target = make_case(k, B, C, T, dtype=dt)
        loss = jax.block_until_ready(multi_domain_loss(mixture, estimate, target, **kw))
        loss_ref = multi_domain_loss_ref(mixture.astype(jnp.float32),
                                         estimate.astype(jnp.float32),
                                         target.astype(jnp.float32))
        assert jnp.allclose(loss, loss_ref, rtol=tol, atol=tol), (B, C, T, dt, loss, loss_ref)

    print("KERNEL_OK")
</pallas_src>

<mosaic_0001>
module attributes {stable_mosaic.version = 11 : i64} {
  func.func @_stats_kernel(%arg0: i32, %arg1: i32, %arg2: i32, %arg3: memref<8x256xf32, #tpu.memory_space<vmem>>, %arg4: memref<8x256xf32, #tpu.memory_space<vmem>>, %arg5: memref<8x256xf32, #tpu.memory_space<vmem>>, %arg6: memref<1x8x8xf32, #tpu.memory_space<vmem>>, %arg7: memref<8x1xf32, #tpu.memory_space<vmem>>, %arg8: memref<8x1xf32, #tpu.memory_space<vmem>>, %arg9: memref<8x1xf32, #tpu.memory_space<vmem>>, %arg10: memref<8x1xf32, #tpu.memory_space<vmem>>, %arg11: memref<8x1xf32, #tpu.memory_space<vmem>>, %arg12: memref<8x1xf32, #tpu.memory_space<vmem>>, %arg13: memref<8x1xf32, #tpu.memory_space<vmem>>) attributes {dimension_semantics = [#tpu.dimension_semantics<parallel>, #tpu.dimension_semantics<parallel>, #tpu.dimension_semantics<arbitrary>], iteration_bounds = array<i64: 1, 1, 1>, scalar_prefetch = 0 : i64, scratch_operands = 7 : i64, tpu.core_type = #tpu.core_type<tc>, window_params = [{transform_indices = @transform_0, window_bounds = array<i64: 8, 256>}, {transform_indices = @transform_1, window_bounds = array<i64: 8, 256>}, {transform_indices = @transform_2, window_bounds = array<i64: 8, 256>}, {transform_indices = @transform_3, window_bounds = array<i64: 1, 8, 8>}]} {
    %c0_i32 = arith.constant 0 : i32
    %0 = arith.cmpi eq, %arg2, %c0_i32 : i32
    %1 = arith.extui %0 : i1 to i32
    %c0_i32_0 = arith.constant 0 : i32
    %2 = arith.cmpi ne, %1, %c0_i32_0 : i32
    scf.if %2 {
      %cst_42 = arith.constant 0.000000e+00 : f32
      %54 = vector.broadcast %cst_42 : f32 to vector<8x1xf32>
      %c0_43 = arith.constant 0 : index
      %c0_44 = arith.constant 0 : index
      %55 = vector.load %arg7[%c0_43, %c0_44] : memref<8x1xf32, #tpu.memory_space<vmem>>, vector<8x1xf32>
      tpu.vector_store %arg7[%c0_43, %c0_44], %54 {strides = array<i32>} : memref<8x1xf32, #tpu.memory_space<vmem>>, vector<8x1xf32>,
      %cst_45 = arith.constant 0.000000e+00 : f32
      %56 = vector.broadcast %cst_45 : f32 to vector<8x1xf32>
      %c0_46 = arith.constant 0 : index
      %c0_47 = arith.constant 0 : index
      %57 = vector.load %arg8[%c0_46, %c0_47] : memref<8x1xf32, #tpu.memory_space<vmem>>, vector<8x1xf32>
      tpu.vector_store %arg8[%c0_46, %c0_47], %56 {strides = array<i32>} : memref<8x1xf32, #tpu.memory_space<vmem>>, vector<8x1xf32>,
      %cst_48 = arith.constant 0.000000e+00 : f32
      %58 = vector.broadcast %cst_48 : f32 to vector<8x1xf32>
      %c0_49 = arith.constant 0 : index
      %c0_50 = arith.constant 0 : index
      %59 = vector.load %arg9[%c0_49, %c0_50] : memref<8x1xf32, #tpu.memory_space<vmem>>, vector<8x1xf32>
      tpu.vector_store %arg9[%c0_49, %c0_50], %58 {strides = array<i32>} : memref<8x1xf32, #tpu.memory_space<vmem>>, vector<8x1xf32>,
      %cst_51 = arith.constant 0.000000e+00 : f32
      %60 = vector.broadcast %cst_51 : f32 to vector<8x1xf32>
      %c0_52 = arith.constant 0 : index
      %c0_53 = arith.constant 0 : index
      %61 = vector.load %arg10[%c0_52, %c0_53] : memref<8x1xf32, #tpu.memory_space<vmem>>, vector<8x1xf32>
      tpu.vector_store %arg10[%c0_52, %c0_53], %60 {strides = array<i32>} : memref<8x1xf32, #tpu.memory_space<vmem>>, vector<8x1xf32>,
      %cst_54 = arith.constant 0.000000e+00 : f32
      %62 = vector.broadcast %cst_54 : f32 to vector<8x1xf32>
      %c0_55 = arith.constant 0 : index
      %c0_56 = arith.constant 0 : index
      %63 = vector.load %arg11[%c0_55, %c0_56] : memref<8x1xf32, #tpu.memory_space<vmem>>, vector<8x1xf32>
      tpu.vector_store %arg11[%c0_55, %c0_56], %62 {strides = array<i32>} : memref<8x1xf32, #tpu.memory_space<vmem>>, vector<8x1xf32>,
      %cst_57 = arith.constant 0.000000e+00 : f32
      %64 = vector.broadcast %cst_57 : f32 to vector<8x1xf32>
      %c0_58 = arith.constant 0 : index
      %c0_59 = arith.constant 0 : index
      %65 = vector.load %arg12[%c0_58, %c0_59] : memref<8x1xf32, #tpu.memory_space<vmem>>, vector<8x1xf32>
      tpu.vector_store %arg12[%c0_58, %c0_59], %64 {strides = array<i32>} : memref<8x1xf32, #tpu.memory_space<vmem>>, vector<8x1xf32>,
      %cst_60 = arith.constant 0.000000e+00 : f32
      %66 = vector.broadcast %cst_60 : f32 to vector<8x1xf32>
      %c0_61 = arith.constant 0 : index
      %c0_62 = arith.constant 0 : index
      %67 = vector.load %arg13[%c0_61, %c0_62] : memref<8x1xf32, #tpu.memory_space<vmem>>, vector<8x1xf32>
      tpu.vector_store %arg13[%c0_61, %c0_62], %66 {strides = array<i32>} : memref<8x1xf32, #tpu.memory_space<vmem>>, vector<8x1xf32>,
    } else {
    }
    %c0 = arith.constant 0 : index
    %c0_1 = arith.constant 0 : index
    %3 = vector.load %arg3[%c0, %c0_1] : memref<8x256xf32, #tpu.memory_space<vmem>>, vector<8x256xf32>
    %c0_2 = arith.constant 0 : index
    %c0_3 = arith.constant 0 : index
    %4 = vector.load %arg4[%c0_2, %c0_3] : memref<8x256xf32, #tpu.memory_space<vmem>>, vector<8x256xf32>
    %c0_4 = arith.constant 0 : index
    %c0_5 = arith.constant 0 : index
    %5 = vector.load %arg5[%c0_4, %c0_5] : memref<8x256xf32, #tpu.memory_space<vmem>>, vector<8x256xf32>
    %6 = arith.subf %3, %5 : vector<8x256xf32>
    %7 = arith.subf %3, %4 : vector<8x256xf32>
    %8 = arith.subf %4, %5 : vector<8x256xf32>
    %c0_6 = arith.constant 0 : index
    %c0_7 = arith.constant 0 : index
    %9 = vector.load %arg7[%c0_6, %c0_7] : memref<8x1xf32, #tpu.memory_space<vmem>>, vector<8x1xf32>
    %10 = arith.mulf %5, %5 : vector<8x256xf32>
    %cst = arith.constant dense<0.000000e+00> : vector<8xf32>
    %11 = vector.multi_reduction <add>, %10, %cst [1] : vector<8x256xf32> to vector<8xf32>
    %12 = vector.shape_cast %11 : vector<8xf32> to vector<8x1xf32>
    %13 = arith.addf %9, %12 : vector<8x1xf32>
    %c0_8 = arith.constant 0 : index
    %c0_9 = arith.constant 0 : index
    %14 = vector.load %arg7[%c0_8, %c0_9] : memref<8x1xf32, #tpu.memory_space<vmem>>, vector<8x1xf32>
    tpu.vector_store %arg7[%c0_8, %c0_9], %13 {strides = array<i32>} : memref<8x1xf32, #tpu.memory_space<vmem>>, vector<8x1xf32>,
    %c0_10 = arith.constant 0 : index
    %c0_11 = arith.constant 0 : index
    %15 = vector.load %arg8[%c0_10, %c0_11] : memref<8x1xf32, #tpu.memory_space<vmem>>, vector<8x1xf32>
    %16 = arith.mulf %6, %6 : vector<8x256xf32>
    %cst_12 = arith.constant dense<0.000000e+00> : vector<8xf32>
    %17 = vector.multi_reduction <add>, %16, %cst_12 [1] : vector<8x256xf32> to vector<8xf32>
    %18 = vector.shape_cast %17 : vector<8xf32> to vector<8x1xf32>
    %19 = arith.addf %15, %18 : vector<8x1xf32>
    %c0_13 = arith.constant 0 : index
    %c0_14 = arith.constant 0 : index
    %20 = vector.load %arg8[%c0_13, %c0_14] : memref<8x1xf32, #tpu.memory_space<vmem>>, vector<8x1xf32>
    tpu.vector_store %arg8[%c0_13, %c0_14], %19 {strides = array<i32>} : memref<8x1xf32, #tpu.memory_space<vmem>>, vector<8x1xf32>,
    %c0_15 = arith.constant 0 : index
    %c0_16 = arith.constant 0 : index
    %21 = vector.load %arg9[%c0_15, %c0_16] : memref<8x1xf32, #tpu.memory_space<vmem>>, vector<8x1xf32>
    %22 = arith.mulf %4, %4 : vector<8x256xf32>
    %cst_17 = arith.constant dense<0.000000e+00> : vector<8xf32>
    %23 = vector.multi_reduction <add>, %22, %cst_17 [1] : vector<8x256xf32> to vector<8xf32>
    %24 = vector.shape_cast %23 : vector<8xf32> to vector<8x1xf32>
    %25 = arith.addf %21, %24 : vector<8x1xf32>
    %c0_18 = arith.constant 0 : index
    %c0_19 = arith.constant 0 : index
    %26 = vector.load %arg9[%c0_18, %c0_19] : memref<8x1xf32, #tpu.memory_space<vmem>>, vector<8x1xf32>
    tpu.vector_store %arg9[%c0_18, %c0_19], %25 {strides = array<i32>} : memref<8x1xf32, #tpu.memory_space<vmem>>, vector<8x1xf32>,
    %c0_20 = arith.constant 0 : index
    %c0_21 = arith.constant 0 : index
    %27 = vector.load %arg10[%c0_20, %c0_21] : memref<8x1xf32, #tpu.memory_space<vmem>>, vector<8x1xf32>
    %28 = arith.mulf %7, %7 : vector<8x256xf32>
    %cst_22 = arith.constant dense<0.000000e+00> : vector<8xf32>
    %29 = vector.multi_reduction <add>, %28, %cst_22 [1] : vector<8x256xf32> to vector<8xf32>
    %30 = vector.shape_cast %29 : vector<8xf32> to vector<8x1xf32>
    %31 = arith.addf %27, %30 : vector<8x1xf32>
    %c0_23 = arith.constant 0 : index
    %c0_24 = arith.constant 0 : index
    %32 = vector.load %arg10[%c0_23, %c0_24] : memref<8x1xf32, #tpu.memory_space<vmem>>, vector<8x1xf32>
    tpu.vector_store %arg10[%c0_23, %c0_24], %31 {strides = array<i32>} : memref<8x1xf32, #tpu.memory_space<vmem>>, vector<8x1xf32>,
    %c0_25 = arith.constant 0 : index
    %c0_26 = arith.constant 0 : index
    %33 = vector.load %arg11[%c0_25, %c0_26] : memref<8x1xf32, #tpu.memory_space<vmem>>, vector<8x1xf32>
    %34 = arith.mulf %4, %5 : vector<8x256xf32>
    %cst_27 = arith.constant dense<0.000000e+00> : vector<8xf32>
    %35 = vector.multi_reduction <add>, %34, %cst_27 [1] : vector<8x256xf32> to vector<8xf32>
    %36 = vector.shape_cast %35 : vector<8xf32> to vector<8x1xf32>
    %37 = arith.addf %33, %36 : vector<8x1xf32>
    %c0_28 = arith.constant 0 : index
    %c0_29 = arith.constant 0 : index
    %38 = vector.load %arg11[%c0_28, %c0_29] : memref<8x1xf32, #tpu.memory_space<vmem>>, vector<8x1xf32>
    tpu.vector_store %arg11[%c0_28, %c0_29], %37 {strides = array<i32>} : memref<8x1xf32, #tpu.memory_space<vmem>>, vector<8x1xf32>,
    %c0_30 = arith.constant 0 : index
    %c0_31 = arith.constant 0 : index
    %39 = vector.load %arg12[%c0_30, %c0_31] : memref<8x1xf32, #tpu.memory_space<vmem>>, vector<8x1xf32>
    %40 = arith.mulf %7, %6 : vector<8x256xf32>
    %cst_32 = arith.constant dense<0.000000e+00> : vector<8xf32>
    %41 = vector.multi_reduction <add>, %40, %cst_32 [1] : vector<8x256xf32> to vector<8xf32>
    %42 = vector.shape_cast %41 : vector<8xf32> to vector<8x1xf32>
    %43 = arith.addf %39, %42 : vector<8x1xf32>
    %c0_33 = arith.constant 0 : index
    %c0_34 = arith.constant 0 : index
    %44 = vector.load %arg12[%c0_33, %c0_34] : memref<8x1xf32, #tpu.memory_space<vmem>>, vector<8x1xf32>
    tpu.vector_store %arg12[%c0_33, %c0_34], %43 {strides = array<i32>} : memref<8x1xf32, #tpu.memory_space<vmem>>, vector<8x1xf32>,
    %c0_35 = arith.constant 0 : index
    %c0_36 = arith.constant 0 : index
    %45 = vector.load %arg13[%c0_35, %c0_36] : memref<8x1xf32, #tpu.memory_space<vmem>>, vector<8x1xf32>
    %46 = arith.mulf %8, %8 : vector<8x256xf32>
    %cst_37 = arith.constant dense<0.000000e+00> : vector<8xf32>
    %47 = vector.multi_reduction <add>, %46, %cst_37 [1] : vector<8x256xf32> to vector<8xf32>
    %48 = vector.shape_cast %47 : vector<8xf32> to vector<8x1xf32>
    %49 = arith.addf %45, %48 : vector<8x1xf32>
    %c0_38 = arith.constant 0 : index
    %c0_39 = arith.constant 0 : index
    %50 = vector.load %arg13[%c0_38, %c0_39] : memref<8x1xf32, #tpu.memory_space<vmem>>, vector<8x1xf32>
    tpu.vector_store %arg13[%c0_38, %c0_39], %49 {strides = array<i32>} : memref<8x1xf32, #tpu.memory_space<vmem>>, vector<8x1xf32>,
    %c0_i32_40 = arith.constant 0 : i32
    %51 = arith.cmpi eq, %arg2, %c0_i32_40 : i32
    %52 = arith.extui %51 : i1 to i32
    %c0_i32_41 = arith.constant 0 : i32
    %53 = arith.cmpi ne, %52, %c0_i32_41 : i32
    scf.if %53 {
      %cst_42 = arith.constant 0.000000e+00 : f32
      %54 = vector.broadcast %cst_42 : f32 to vector<8x1xf32>
      %c0_43 = arith.constant 0 : index
      %c0_44 = arith.constant 0 : index
      %55 = vector.load %arg7[%c0_43, %c0_44] : memref<8x1xf32, #tpu.memory_space<vmem>>, vector<8x1xf32>
      %c0_45 = arith.constant 0 : index
      %c0_46 = arith.constant 0 : index
      %56 = vector.load %arg8[%c0_45, %c0_46] : memref<8x1xf32, #tpu.memory_space<vmem>>, vector<8x1xf32>
      %c0_47 = arith.constant 0 : index
      %c0_48 = arith.constant 0 : index
      %57 = vector.load %arg9[%c0_47, %c0_48] : memref<8x1xf32, #tpu.memory_space<vmem>>, vector<8x1xf32>
      %c0_49 = arith.constant 0 : index
      %c0_50 = arith.constant 0 : index
      %58 = vector.load %arg10[%c0_49, %c0_50] : memref<8x1xf32, #tpu.memory_space<vmem>>, vector<8x1xf32>
      %c0_51 = arith.constant 0 : index
      %c0_52 = arith.constant 0 : index
      %59 = vector.load %arg11[%c0_51, %c0_52] : memref<8x1xf32, #tpu.memory_space<vmem>>, vector<8x1xf32>
      %c0_53 = arith.constant 0 : index
      %c0_54 = arith.constant 0 : index
      %60 = vector.load %arg12[%c0_53, %c0_54] : memref<8x1xf32, #tpu.memory_space<vmem>>, vector<8x1xf32>
      %c0_55 = arith.constant 0 : index
      %c0_56 = arith.constant 0 : index
      %61 = vector.load %arg13[%c0_55, %c0_56] : memref<8x1xf32, #tpu.memory_space<vmem>>, vector<8x1xf32>
      %62 = tpu.concatenate %55, %56, %57, %58, %59, %60, %61, %54 in 1 : vector<8x1xf32>, vector<8x1xf32>, vector<8x1xf32>, vector<8x1xf32>, vector<8x1xf32>, vector<8x1xf32>, vector<8x1xf32>, vector<8x1xf32> -> vector<8x8xf32>
      %c0_57 = arith.constant 0 : index
      %c0_58 = arith.constant 0 : index
      %c0_59 = arith.constant 0 : index
      %63 = vector.load %arg6[%c0_57, %c0_58, %c0_59] : memref<1x8x8xf32, #tpu.memory_space<vmem>>, vector<1x8x8xf32>
      %64 = vector.shape_cast %63 : vector<1x8x8xf32> to vector<8x8xf32>
      %65 = vector.shape_cast %62 : vector<8x8xf32> to vector<1x8x8xf32>
      tpu.vector_store %arg6[%c0_57, %c0_58, %c0_59], %65 {strides = array<i32>} : memref<1x8x8xf32, #tpu.memory_space<vmem>>, vector<1x8x8xf32>,
    } else {
    }
    return
  }
  func.func @transform_0(%arg0: i32, %arg1: i32, %arg2: i32) -> (i32, i32) {
    %c1_i32 = arith.constant 1 : i32
    %0 = arith.muli %arg1, %c1_i32 : i32
    %1 = arith.addi %0, %arg2 : i32
    %c0_i32 = arith.constant 0 : i32
    return %arg0, %1 : i32, i32
  }
  func.func @transform_1(%arg0: i32, %arg1: i32, %arg2: i32) -> (i32, i32) {
    %c1_i32 = arith.constant 1 : i32
    %0 = arith.muli %arg1, %c1_i32 : i32
    %1 = arith.addi %0, %arg2 : i32
    %c0_i32 = arith.constant 0 : i32
    return %arg0, %1 : i32, i32
  }
  func.func @transform_2(%arg0: i32, %arg1: i32, %arg2: i32) -> (i32, i32) {
    %c1_i32 = arith.constant 1 : i32
    %0 = arith.muli %arg1, %c1_i32 : i32
    %1 = arith.addi %0, %arg2 : i32
    %c0_i32 = arith.constant 0 : i32
    return %arg0, %1 : i32, i32
  }
  func.func @transform_3(%arg0: i32, %arg1: i32, %arg2: i32) -> (i32, i32, i32) {
    %c0_i32 = arith.constant 0 : i32
    %c0_i32_0 = arith.constant 0 : i32
    return %arg1, %arg0, %c0_i32 : i32, i32, i32
  }
}

</mosaic_0001>

<bundles_post_ra>
// kernel: tpu_custom_call.1
= control target key start
LH: loop header
LB: loop body
LE: loop exit
PB: predicated region body
PF: predicated region fallthrough
CT: control target
= control target key end

     0   :  { %8 = vsyncpa [#allocation10], 0  ;;  %s369_s0 = inlined_call_operand.hbm [shape: f32[8,256], index: 0, kind: input, shape index: {}]   ;;  %s370_s1 = inlined_call_operand.hbm [shape: f32[8,256], index: 1, kind: input, shape index: {}]   ;;  %s371_s2 = inlined_call_operand.hbm [shape: f32[8,256], index: 2, kind: input, shape index: {}]   ;;  %s372_s3 = inlined_call_operand.hbm [shape: f32[1,8,8], index: 3, kind: output, shape index: {}]  }
   0x1   :  { %9 = vsyncpa [#allocation13], 0 }
   0x2   :  { %10 = vsyncpa [#allocation11], 0  ;;  %s311_s12 = smov [#allocation12]   ;;  %s312_s14 = smov [#allocation9]  }
   0x3   :  { %s35_s13 = sshll.u32 %s311_s12, 4  ;;  %s21_s15 = sshll.u32 %s312_s14, 4  ;;  %s36_s13 = int_to_ptr.vmem [resolvable:$true] %s35_s13  ;;  %s22_s15 = int_to_ptr.vmem [resolvable:$true] %s21_s15 }
   0x4   :  { %s233_s16 = scalar_lea.vmem %s36_s13, 256  ;;  %p238_p1 = scmp.lt.s32.totalorder %s36_s13, %s36_s13 }
   0x5   :  { %p234_p0 = scmp.ne.s32.totalorder %s36_s13, %s233_s16  ;;  %p239_p2 = scmp.lt.s32.totalorder %s233_s16, %s233_s16 }
   0x7   :  { %p240_p3 = por %p239_p2, %p238_p1 }
   0x9   :  { %p241_p4 = pnand %p240_p3, %p234_p0 }
   0xb   :  { %244 = shalt.err (!%p241_p4)
}
   0xc   :  { %38 = dma.hbm_to_vmem [thread:$0]  %s370_s1, 256, %s36_s13, [#allocation13]  }
   0xd   :  { %s253_s19 = scalar_lea.vmem %s22_s15, 256  ;;  %p258_p6 = scmp.lt.s32.totalorder %s22_s15, %s22_s15 }
   0xe   :  { %p254_p5 = scmp.ne.s32.totalorder %s22_s15, %s253_s19  ;;  %p259_p7 = scmp.lt.s32.totalorder %s253_s19, %s253_s19 }
  0x10   :  { %p260_p8 = por %p259_p7, %p258_p6 }
  0x12   :  { %p261_p9 = pnand %p260_p8, %p254_p5 }
  0x14   :  { %264 = shalt.err (!%p261_p9)
}
  0x15   :  { %24 = dma.hbm_to_vmem [thread:$0]  %s369_s0, 256, %s22_s15, [#allocation10]  }
  0x16   :  { %s313_s22 = smov [#allocation14]  }
  0x17   :  { %s49_s23 = sshll.u32 %s313_s22, 4  ;;  %s50_s23 = int_to_ptr.vmem [resolvable:$true] %s49_s23 }
  0x18   :  { %s273_s24 = scalar_lea.vmem %s50_s23, 256  ;;  %p278_p11 = scmp.lt.s32.totalorder %s50_s23, %s50_s23 }
  0x19   :  { %p274_p10 = scmp.ne.s32.totalorder %s50_s23, %s273_s24  ;;  %p279_p12 = scmp.lt.s32.totalorder %s273_s24, %s273_s24 }
  0x1b   :  { %p280_p13 = por %p279_p12, %p278_p11 }
  0x1d   :  { %p281_p0 = pnand %p280_p13, %p274_p10 }
  0x1f   :  { %284 = shalt.err (!%p281_p0)
}
  0x20   :  { %52 = dma.hbm_to_vmem [thread:$0]  %s371_s2, 256, %s50_s23, [#allocation13]  }
  0x21   :  { %305 = dma.done.wait [#allocation10], 256  }
  0x22   :  { %306 = vsyncadd [#allocation10], 4294967040 }
  0x23   :  { %307 = dma.done.wait [#allocation13], 512  }
  0x24   :  { %308 = vsyncadd [#allocation13], 4294966784  ;;  %vm72_vm0 = vcmask 7168   ;;  %v314_v0 = vmov 0.0   ;;  %v82_v1 = vld [vmem:[#allocation12] sm:$0xff]  ;;  %v83_v2 = vld [vmem:[#allocation12 + $0x8] sm:$0xff] }
  0x25   :  { %77 = vst.msk [vmem:[#allocation6] sm:$0xff] %vm72_vm0, %v314_v0  ;;  %73 = vst.msk [vmem:[#allocation2] sm:$0xff] %vm72_vm0, %v314_v0  ;;  %v84_v3 = vld [vmem:[#allocation14] sm:$0xff]  ;;  %v85_v4 = vld [vmem:[#allocation14 + $0x8] sm:$0xff]  ;;  %v110_v6 = vmul.f32 %v82_v1, %v82_v1  ;;  %v111_v7 = vmul.f32 %v83_v2, %v83_v2  ;;  %s315_s0 = smov 2   ;;  %s316_s2 = smov 4  }
  0x26   :  { %74 = vst.msk [vmem:[#allocation3] sm:$0xff] %vm72_vm0, %v314_v0  ;;  %75 = vst.msk [vmem:[#allocation4] sm:$0xff] %vm72_vm0, %v314_v0  ;;  %v126_v5 = vmul.f32 %v84_v3, %v82_v1  ;;  %v80_v8 = vld [vmem:[#allocation9] sm:$0xff]  ;;  %v81_v9 = vld [vmem:[#allocation9 + $0x8] sm:$0xff]  ;;  %v90_v10 = vsub.f32 %v82_v1, %v84_v3  ;;  %v127_v11 = vmul.f32 %v85_v4, %v83_v2  ;;  %s317_s26 = smov 1   ;;  %s318_s27 = smov 3  }
  0x27   :  { %76 = vst.msk [vmem:[#allocation5] sm:$0xff] %vm72_vm0, %v314_v0  ;;  %78 = vst.msk [vmem:[#allocation7] sm:$0xff] %vm72_vm0, %v314_v0  ;;  %v86_v12 = vsub.f32 %v80_v8, %v84_v3  ;;  %v87_v13 = vsub.f32 %v81_v9, %v85_v4  ;;  %v88_v14 = vsub.f32 %v80_v8, %v82_v1  ;;  %s319_s28 = smov 6   ;;  %s320_s29 = smov 5   ;;  %vm184_vm1 = vcmask 15360  }
  0x28   :  { %79 = vst.msk [vmem:[#allocation8] sm:$0xff] %vm72_vm0, %v314_v0  ;;  %v112_v15 = vadd.f32 %v111_v7, %v110_v6  ;;  %v89_v16 = vsub.f32 %v81_v9, %v83_v2  ;;  %v91_v17 = vsub.f32 %v83_v2, %v85_v4  ;;  %v128_v18 = vadd.f32 %v127_v11, %v126_v5  ;;  %s321_s30 = smov [#allocation15]  }
  0x29   :  { %v102_v19 = vmul.f32 %v86_v12, %v86_v12  ;;  %v103_v20 = vmul.f32 %v87_v13, %v87_v13  ;;  %v118_v21 = vmul.f32 %v88_v14, %v88_v14  ;;  %v134_v23 = vmul.f32 %v88_v14, %v86_v12  ;;  %s204_s4 = sshll.u32 %s321_s30, 4  ;;  %s205_s4 = int_to_ptr.vmem [resolvable:$true] %s204_s4 }
  0x2a   :  { %113 = vadd.xlane.f32.xlu0 %v112_v15  ;;  %v119_v22 = vmul.f32 %v89_v16, %v89_v16  ;;  %v135_v24 = vmul.f32 %v89_v16, %v87_v13  ;;  %129 = vadd.xlane.f32.xlu1 %v128_v18  ;;  %v142_v26 = vmul.f32 %v90_v10, %v90_v10  ;;  %vm186_vm2 = vcmask 23552   ;;  %s285_s5 = scalar_lea.vmem %s205_s4, 128  ;;  %p290_p2 = scmp.lt.s32.totalorder %s205_s4, %s205_s4 }
  0x2b   :  { %v104_v25 = vadd.f32 %v103_v20, %v102_v19  ;;  %v143_v27 = vmul.f32 %v91_v17, %v91_v17  ;;  %v93_v30 = vmul.f32 %v84_v3, %v84_v3  ;;  %v94_v31 = vmul.f32 %v85_v4, %v85_v4  ;;  %p286_p1 = scmp.ne.s32.totalorder %s205_s4, %s285_s5  ;;  %p291_p3 = scmp.lt.s32.totalorder %s285_s5, %s285_s5 }
  0x2c   :  { %v120_v28 = vadd.f32 %v119_v22, %v118_v21  ;;  %v136_v29 = vadd.f32 %v135_v24, %v134_v23  ;;  %v125_v35 = vld [vmem:[#allocation6] sm:$0xff]  ;;  %vm188_vm3 = vcmask 31744   ;;  %vm190_vm4 = vcmask 39936  }
  0x2d   :  { %v144_v32 = vadd.f32 %v143_v27, %v142_v26  ;;  %v95_v33 = vadd.f32 %v94_v31, %v93_v30  ;;  %v109_v34 = vld [vmem:[#allocation4] sm:$0xff]  ;;  %v101_v40 = vld [vmem:[#allocation3] sm:$0xff]  ;;  %v92_v53 = vld [vmem:[#allocation2] sm:$0xff]  ;;  %vm192_vm5 = vcmask 48128   ;;  %vm194_vm6 = vcmask 56320   ;;  %p292_p4 = por %p291_p3, %p290_p2 }
  0x2e   :  { %105 = vadd.xlane.f32.xlu0 %v104_v25  ;;  %121 = vadd.xlane.f32.xlu1 %v120_v28  ;;  %v117_v41 = vld [vmem:[#allocation5] sm:$0xff]  ;;  %v133_v46 = vld [vmem:[#allocation7] sm:$0xff]  ;;  %vm196_vm7 = vcmask 64512  }
  0x2f   :  { %v141_v47 = vld [vmem:[#allocation8] sm:$0xff]  ;;  %p293_p5 = pnand %p292_p4, %p286_p1 }
  0x32   :  { %137 = vadd.xlane.f32.xlu0 %v136_v29  ;;  %145 = vadd.xlane.f32.xlu1 %v144_v32 }
  0x36   :  { %96 = vadd.xlane.f32.xlu0 %v95_v33 }
  0xb3   :  { %v114_v36 = vpop.xlane.xlu0 %113  ;;  %v130_v37 = vpop.xlane.xlu1 %129 }
  0xb4   :  { %v115_v38 = vadd.f32 %v114_v36, %v109_v34  ;;  %v131_v39 = vadd.f32 %v130_v37, %v125_v35 }
  0xb6   :  { %116 = vst.msk [vmem:[#allocation4] sm:$0xff] %vm72_vm0, %v115_v38  ;;  %132 = vst.msk [vmem:[#allocation6] sm:$0xff] %vm72_vm0, %v131_v39 }
  0xb7   :  { %v106_v42 = vpop.xlane.xlu0 %105  ;;  %v122_v44 = vpop.xlane.xlu1 %121 }
  0xb8   :  { %v107_v43 = vadd.f32 %v106_v42, %v101_v40  ;;  %v123_v45 = vadd.f32 %v122_v44, %v117_v41 }
  0xba   :  { %108 = vst.msk [vmem:[#allocation3] sm:$0xff] %vm72_vm0, %v107_v43  ;;  %124 = vst.msk [vmem:[#allocation5] sm:$0xff] %vm72_vm0, %v123_v45 }
  0xbb   :  { %v138_v48 = vpop.xlane.xlu0 %137  ;;  %v146_v50 = vpop.xlane.xlu1 %145 }
  0xbc   :  { %v139_v49 = vadd.f32 %v138_v48, %v133_v46  ;;  %v147_v52 = vadd.f32 %v146_v50, %v141_v47 }
  0xbd   :  { %v154_v51 = vld [vmem:[#allocation4] sm:$0xff]  ;;  %v156_v54 = vld [vmem:[#allocation6] sm:$0xff] }
  0xbe   :  { %164 = vrot.lane.b32.xlu0 %v154_v51, %s315_s0  ;;  %140 = vst.msk [vmem:[#allocation7] sm:$0xff] %vm72_vm0, %v139_v49  ;;  %172 = vrot.lane.b32.xlu1 %v156_v54, %s316_s2  ;;  %148 = vst.msk [vmem:[#allocation8] sm:$0xff] %vm72_vm0, %v147_v52 }
  0xbf   :  { %v97_v55 = vpop.xlane.xlu0 %96 }
  0xc0   :  { %v98_v56 = vadd.f32 %v97_v55, %v92_v53 }
  0xc1   :  { %v153_v57 = vld [vmem:[#allocation3] sm:$0xff]  ;;  %v155_v58 = vld [vmem:[#allocation5] sm:$0xff] }
  0xc2   :  { %100 = vst.msk [vmem:[#allocation2] sm:$0xff] %vm72_vm0, %v98_v56  ;;  %160 = vrot.lane.b32.xlu1 %v153_v57, %s317_s26 }
  0xc5   :  { %v158_v59 = vld [vmem:[#allocation8] sm:$0xff]  ;;  %v157_v60 = vld [vmem:[#allocation7] sm:$0xff] }
  0xc6   :  { %168 = vrot.lane.b32.xlu1 %v155_v58, %s318_s27  ;;  %180 = vrot.lane.b32.xlu0 %v158_v59, %s319_s28 }
  0xc9   :  { %v152_v62 = vld [vmem:[#allocation2] sm:$0xff] }
  0xca   :  { %176 = vrot.lane.b32.xlu1 %v157_v60, %s320_s29 }
 0x130   :  { %v173_v61 = vpop.permute.xlu1 %172  ;;  %v165_v1 = vpop.permute.xlu0 %164 }
 0x134   :  { %v161_v63 = vpop.permute.xlu1 %160 }
 0x135   :  { %v183_v0 = vsel %vm72_vm0, %v152_v62, %v161_v63 }
 0x136   :  { %v185_v3 = vsel %vm184_vm1, %v183_v0, %v165_v1 }
 0x138   :  { %v169_v2 = vpop.permute.xlu1 %168  ;;  %v181_v5 = vpop.permute.xlu0 %180 }
 0x139   :  { %v187_v4 = vsel %vm186_vm2, %v185_v3, %v169_v2 }
 0x13a   :  { %v189_v7 = vsel %vm188_vm3, %v187_v4, %v173_v61 }
 0x13c   :  { %v177_v6 = vpop.permute.xlu1 %176 }
 0x13d   :  { %v191_v8 = vsel %vm190_vm4, %v189_v7, %v177_v6 }
 0x13e   :  { %v193_v9 = vsel %vm192_vm5, %v191_v8, %v181_v5 }
 0x13f   :  { %v195_v10 = vsel %vm194_vm6, %v193_v9, 0.0 }
 0x140   :  { %197 = vst.msk [vmem:[#allocation15] sm:$0xff] %vm196_vm7, %v195_v10 }
 0x141   :  { %296 = shalt.err (!%p293_p5)
}
 0x142   :  { %207 = dma.vmem_to_hbm [thread:$0]  %s205_s4, 128, %s372_s3, [#allocation11]  }
 0x143   :  { %309 = dma.done.wait [#allocation11], 128  }
 0x144   :  { %310 = vsyncadd [#allocation11], 4294967168 }
 0x145   :  { %211 = vsyncpa [#allocation10], 1 }
 0x146   :  { %212 = vsyncpa [#allocation13], 1 }
 0x147   :  { %213 = vsyncpa [#allocation11], 1 }

</bundles_post_ra>
